<compile_context>
chip_gen: v7x
topology: tpu7x:2x2x1
jax: 0.10.0
libtpu: 0.0.40
codegen_flags: <defaults>
</compile_context>

<pallas_src>
import functools

import jax
import jax.numpy as jnp
from jax.experimental import pallas as pl
from jax.experimental.pallas import tpu as pltpu

DEGREE = 9
D1 = DEGREE + 1  # number of Chebyshev basis functions per input feature


def _round_up(n, m):
    return ((n + m - 1) // m) * m


def chebykan_kernel(x_ref, c1_ref, b1_ref, c2_ref, b2_ref, o_ref,
                    basis1_ref, basis2_ref):
    """Fused two-layer ChebyKAN forward on one batch tile.

    x_ref     : (TB, IN_P)               f32  input activations (VMEM)
    c1_ref    : (DEGREE*IN_P, HID_P)     bf16 layer-1 fused coefficients (d-major)
    b1_ref    : (1, HID_P)               f32  layer-1 bias (sum_i coeff[i,:,0])
    c2_ref    : (DEGREE*HID_P, OUT_P)    bf16 layer-2 fused coefficients
    b2_ref    : (1, OUT_P)               f32  layer-2 bias
    o_ref     : (TB, OUT_P)                   output activations (VMEM)
    basis1_ref: (TB, DEGREE*IN_P)        bf16 scratch basis, layer 1
    basis2_ref: (TB, DEGREE*HID_P)       bf16 scratch basis, layer 2
    """

    def layer(h, c_ref, b_ref, basis_ref):
        dim = h.shape[-1]                      # static, multiple of 128
        bdt = basis_ref.dtype
        t = jnp.tanh(h)                        # the only transcendental (EUP)
        two_t = t + t                          # hoisted -> 2 VALU ops per step
        basis_ref[:, 0:dim] = t.astype(bdt)    # T1 (lane-aligned store)
        t_prev = t
        t_cur = two_t * t - 1.0                # T2
        basis_ref[:, dim:2 * dim] = t_cur.astype(bdt)
        for d in range(3, D1):                 # T3..T9: VPU-only recurrence
            t_prev, t_cur = t_cur, two_t * t_cur - t_prev
            basis_ref[:, (d - 1) * dim:d * dim] = t_cur.astype(bdt)
        # Single fused-K MXU matmul straight from the bf16 scratch basis.
        out = jnp.dot(basis_ref[...], c_ref[...],
                      preferred_element_type=jnp.float32)
        return out + b_ref[...]                # f32 bias (T0 contribution)

    x = x_ref[...].astype(jnp.float32)
    h = layer(x, c1_ref, b1_ref, basis1_ref)
    y = layer(h, c2_ref, b2_ref, basis2_ref)
    o_ref[...] = y.astype(o_ref.dtype)


def _prep_layer_params(coeff, in_pad, out_pad, matmul_dtype):
    """PyTorch-layout coeff (in, out, D1) -> fused (DEGREE*in_pad, out_pad) + bias.

    Input-feature padding inserts zero K rows at EVERY degree, so padded
    features (whose even-degree basis values are nonzero) contribute nothing.
    """
    i_dim, o_dim, _ = coeff.shape
    bias = jnp.sum(coeff[:, :, 0], axis=0)                     # T0 == 1 term
    w = jnp.transpose(coeff[:, :, 1:], (2, 0, 1))              # (DEGREE, in, out)
    w = jnp.pad(w, ((0, 0), (0, in_pad - i_dim), (0, out_pad - o_dim)))
    w = w.reshape(DEGREE * in_pad, out_pad)                    # d-major fused K
    bias = jnp.pad(bias, (0, out_pad - o_dim))
    return w.astype(matmul_dtype), bias.reshape(1, out_pad).astype(jnp.float32)


@functools.partial(jax.jit,
                   static_argnames=("tile_b", "matmul_dtype", "out_dtype"))
def chebykan_forward(x, coeff1, coeff2, *, tile_b=None,
                     matmul_dtype=jnp.bfloat16, out_dtype=None):
    """x: (B, IN) f32; coeff*: PyTorch layout (in, out, degree+1)."""
    B, IN = x.shape
    HID = coeff1.shape[1]
    OUT = coeff2.shape[1]
    assert coeff1.shape == (IN, HID, D1)
    assert coeff2.shape == (HID, OUT, D1)
    out_dtype = x.dtype if out_dtype is None else out_dtype

    # 128-lane alignment for every feature dimension -> unmasked vld/vst.
    IN_P = _round_up(IN, 128)
    HID_P = _round_up(HID, 128)
    OUT_P = _round_up(OUT, 128)

    c1, b1 = _prep_layer_params(coeff1, IN_P, HID_P, matmul_dtype)
    c2, b2 = _prep_layer_params(coeff2, HID_P, OUT_P, matmul_dtype)

    # --- batch tiling -------------------------------------------------------
    if tile_b is None:
        # 512-row tiles amortize per-grid-step overhead on narrow layers;
        # fall back to 256 for very wide layers to keep VMEM in check.
        tile_b = 512 if max(IN_P, HID_P, OUT_P) <= 512 else 256
    if B >= 32:
        # Prefer >= 2 grid steps so v7x's two TensorCores both get work.
        tb = min(tile_b, _round_up(-(-B // 2), 16))
    else:
        tb = _round_up(B, 16)                   # bf16 sublane packing is 16
    steps = -(-B // tb)
    if steps > 1 and steps % 2 == 1:            # keep the step count even
        tb = _round_up(-(-B // (steps + 1)), 16)
    B_P = _round_up(B, tb)

    if B_P != B or IN_P != IN:
        x = jnp.pad(x, ((0, B_P - B), (0, IN_P - IN)))

    grid = (B_P // tb,)

    # --- VMEM budget (weights x1 single-buffered, x/out tiles x2, scratch) ---
    wdt = jnp.dtype(matmul_dtype).itemsize
    w_bytes = (c1.size + c2.size) * wdt
    b_bytes = (b1.size + b2.size) * 4
    x_bytes = 2 * tb * IN_P * jnp.dtype(x.dtype).itemsize
    o_bytes = 2 * tb * OUT_P * jnp.dtype(out_dtype).itemsize
    basis_bytes = tb * DEGREE * (IN_P + HID_P) * wdt
    work_bytes = 6 * tb * max(IN_P, HID_P, OUT_P) * 4   # f32 recurrence/h temps
    needed = w_bytes + b_bytes + x_bytes + o_bytes + basis_bytes + work_bytes
    vmem_limit = int(min(max(needed + (4 << 20), 32 << 20), 100 << 20))

    out = pl.pallas_call(
        chebykan_kernel,
        out_shape=jax.ShapeDtypeStruct((B_P, OUT_P), out_dtype),
        grid_spec=pltpu.PrefetchScalarGridSpec(
            num_scalar_prefetch=0,
            grid=grid,
            in_specs=[
                pl.BlockSpec((tb, IN_P), lambda i: (i, 0)),    # batch-tiled x
                # Grid-invariant weights/biases: single-buffered (no re-DMA,
                # half the VMEM residency vs. default double buffering).
                pl.BlockSpec((DEGREE * IN_P, HID_P), lambda i: (0, 0),
                             pipeline_mode=pl.Buffered(1)),
                pl.BlockSpec((1, HID_P), lambda i: (0, 0),
                             pipeline_mode=pl.Buffered(1)),
                pl.BlockSpec((DEGREE * HID_P, OUT_P), lambda i: (0, 0),
                             pipeline_mode=pl.Buffered(1)),
                pl.BlockSpec((1, OUT_P), lambda i: (0, 0),
                             pipeline_mode=pl.Buffered(1)),
            ],
            out_specs=pl.BlockSpec((tb, OUT_P), lambda i: (i, 0)),
            scratch_shapes=[
                pltpu.VMEM((tb, DEGREE * IN_P), matmul_dtype),   # basis, layer 1
                pltpu.VMEM((tb, DEGREE * HID_P), matmul_dtype),  # basis, layer 2
            ],
        ),
        compiler_params=pltpu.CompilerParams(
            dimension_semantics=("parallel",),   # batch tiles shard across TCs
            vmem_limit_bytes=vmem_limit,
        ),
    )(x, c1, b1, c2, b2)
    return out[:B, :OUT]


def chebykan_reference(x, coeff1, coeff2):
    """Pure-JAX f32 reference mirroring the PyTorch forward exactly."""
    def layer(h, coeff):
        t = jnp.tanh(h)
        theta = jnp.arccos(t)                                    # (B, I)
        d = jnp.arange(D1, dtype=jnp.float32)
        T = jnp.cos(theta[:, :, None] * d[None, None, :])        # (B, I, D1)
        return jnp.einsum("bid,iod->bo", T, coeff)
    return layer(layer(x, coeff1), coeff2)


if __name__ == "__main__":
    # Small deterministic setup: layers = (32, 64, 16), batch = 16.
    IN, HID, OUT = 32, 64, 16
    B = 16

    key = jax.random.PRNGKey(0)
    kx, k1, k2 = jax.random.split(key, 3)

    x = jax.random.normal(kx, (B, IN), dtype=jnp.float32)

    # nn.init.normal_(coeffs, mean=0, std=1/(input_dim*(degree+1)))
    coeff1 = jax.random.normal(k1, (IN, HID, D1), dtype=jnp.float32) / (IN * D1)
    coeff2 = jax.random.normal(k2, (HID, OUT, D1), dtype=jnp.float32) / (HID * D1)

    out = chebykan_forward(x, coeff1, coeff2)
    out = jax.block_until_ready(out)

    ref = chebykan_reference(x, coeff1, coeff2)
    assert out.shape == (B, OUT), out.shape
    # bf16 matmul operands with f32 accumulation: tolerance loosened accordingly.
    max_err = jnp.max(jnp.abs(out - ref))
    assert jnp.allclose(out, ref, atol=3e-3, rtol=3e-2), f"max abs err {max_err}"

    print("KERNEL_OK")
</pallas_src>

<mosaic_0001>
module attributes {stable_mosaic.version = 11 : i64} {
  func.func @chebykan_kernel(%arg0: i32, %arg1: memref<16x128xf32, #tpu.memory_space<vmem>>, %arg2: memref<1152x128xbf16, #tpu.memory_space<vmem>>, %arg3: memref<1x128xf32, #tpu.memory_space<vmem>>, %arg4: memref<1152x128xbf16, #tpu.memory_space<vmem>>, %arg5: memref<1x128xf32, #tpu.memory_space<vmem>>, %arg6: memref<16x128xf32, #tpu.memory_space<vmem>>, %arg7: memref<16x1152xbf16, #tpu.memory_space<vmem>>, %arg8: memref<16x1152xbf16, #tpu.memory_space<vmem>>) attributes {dimension_semantics = [#tpu.dimension_semantics<parallel>], iteration_bounds = array<i64: 1>, scalar_prefetch = 0 : i64, scratch_operands = 2 : i64, tpu.core_type = #tpu.core_type<tc>, window_params = [{transform_indices = @transform_0, window_bounds = array<i64: 16, 128>}, {pipeline_mode = #tpu.pipeline_mode<synchronous>, transform_indices = @transform_1, window_bounds = array<i64: 1152, 128>}, {pipeline_mode = #tpu.pipeline_mode<synchronous>, transform_indices = @transform_2, window_bounds = array<i64: 1, 128>}, {pipeline_mode = #tpu.pipeline_mode<synchronous>, transform_indices = @transform_3, window_bounds = array<i64: 1152, 128>}, {pipeline_mode = #tpu.pipeline_mode<synchronous>, transform_indices = @transform_4, window_bounds = array<i64: 1, 128>}, {transform_indices = @transform_5, window_bounds = array<i64: 16, 128>}]} {
    %c0 = arith.constant 0 : index
    %c0_0 = arith.constant 0 : index
    %0 = vector.load %arg1[%c0, %c0_0] : memref<16x128xf32, #tpu.memory_space<vmem>>, vector<16x128xf32>
    %1 = math.tanh %0 : vector<16x128xf32>
    %2 = arith.addf %1, %1 : vector<16x128xf32>
    %3 = arith.truncf %1 : vector<16x128xf32> to vector<16x128xbf16>
    %c0_1 = arith.constant 0 : index
    %c0_2 = arith.constant 0 : index
    %4 = vector.load %arg7[%c0_1, %c0_2] : memref<16x1152xbf16, #tpu.memory_space<vmem>>, vector<16x128xbf16>
    tpu.vector_store %arg7[%c0_1, %c0_2], %3 {strides = array<i32>} : memref<16x1152xbf16, #tpu.memory_space<vmem>>, vector<16x128xbf16>,
    %5 = arith.mulf %2, %1 : vector<16x128xf32>
    %cst = arith.constant 1.000000e+00 : f32
    %6 = vector.broadcast %cst : f32 to vector<16x128xf32>
    %7 = arith.subf %5, %6 : vector<16x128xf32>
    %8 = arith.truncf %7 : vector<16x128xf32> to vector<16x128xbf16>
    %c0_3 = arith.constant 0 : index
    %c128 = arith.constant 128 : index
    %9 = vector.load %arg7[%c0_3, %c128] : memref<16x1152xbf16, #tpu.memory_space<vmem>>, vector<16x128xbf16>
    tpu.vector_store %arg7[%c0_3, %c128], %8 {strides = array<i32>} : memref<16x1152xbf16, #tpu.memory_space<vmem>>, vector<16x128xbf16>,
    %10 = arith.mulf %2, %7 : vector<16x128xf32>
    %11 = arith.subf %10, %1 : vector<16x128xf32>
    %12 = arith.truncf %11 : vector<16x128xf32> to vector<16x128xbf16>
    %c0_4 = arith.constant 0 : index
    %c256 = arith.constant 256 : index
    %13 = vector.load %arg7[%c0_4, %c256] : memref<16x1152xbf16, #tpu.memory_space<vmem>>, vector<16x128xbf16>
    tpu.vector_store %arg7[%c0_4, %c256], %12 {strides = array<i32>} : memref<16x1152xbf16, #tpu.memory_space<vmem>>, vector<16x128xbf16>,
    %14 = arith.mulf %2, %11 : vector<16x128xf32>
    %15 = arith.subf %14, %7 : vector<16x128xf32>
    %16 = arith.truncf %15 : vector<16x128xf32> to vector<16x128xbf16>
    %c0_5 = arith.constant 0 : index
    %c384 = arith.constant 384 : index
    %17 = vector.load %arg7[%c0_5, %c384] : memref<16x1152xbf16, #tpu.memory_space<vmem>>, vector<16x128xbf16>
    tpu.vector_store %arg7[%c0_5, %c384], %16 {strides = array<i32>} : memref<16x1152xbf16, #tpu.memory_space<vmem>>, vector<16x128xbf16>,
    %18 = arith.mulf %2, %15 : vector<16x128xf32>
    %19 = arith.subf %18, %11 : vector<16x128xf32>
    %20 = arith.truncf %19 : vector<16x128xf32> to vector<16x128xbf16>
    %c0_6 = arith.constant 0 : index
    %c512 = arith.constant 512 : index
    %21 = vector.load %arg7[%c0_6, %c512] : memref<16x1152xbf16, #tpu.memory_space<vmem>>, vector<16x128xbf16>
    tpu.vector_store %arg7[%c0_6, %c512], %20 {strides = array<i32>} : memref<16x1152xbf16, #tpu.memory_space<vmem>>, vector<16x128xbf16>,
    %22 = arith.mulf %2, %19 : vector<16x128xf32>
    %23 = arith.subf %22, %15 : vector<16x128xf32>
    %24 = arith.truncf %23 : vector<16x128xf32> to vector<16x128xbf16>
    %c0_7 = arith.constant 0 : index
    %c640 = arith.constant 640 : index
    %25 = vector.load %arg7[%c0_7, %c640] : memref<16x1152xbf16, #tpu.memory_space<vmem>>, vector<16x128xbf16>
    tpu.vector_store %arg7[%c0_7, %c640], %24 {strides = array<i32>} : memref<16x1152xbf16, #tpu.memory_space<vmem>>, vector<16x128xbf16>,
    %26 = arith.mulf %2, %23 : vector<16x128xf32>
    %27 = arith.subf %26, %19 : vector<16x128xf32>
    %28 = arith.truncf %27 : vector<16x128xf32> to vector<16x128xbf16>
    %c0_8 = arith.constant 0 : index
    %c768 = arith.constant 768 : index
    %29 = vector.load %arg7[%c0_8, %c768] : memref<16x1152xbf16, #tpu.memory_space<vmem>>, vector<16x128xbf16>
    tpu.vector_store %arg7[%c0_8, %c768], %28 {strides = array<i32>} : memref<16x1152xbf16, #tpu.memory_space<vmem>>, vector<16x128xbf16>,
    %30 = arith.mulf %2, %27 : vector<16x128xf32>
    %31 = arith.subf %30, %23 : vector<16x128xf32>
    %32 = arith.truncf %31 : vector<16x128xf32> to vector<16x128xbf16>
    %c0_9 = arith.constant 0 : index
    %c896 = arith.constant 896 : index
    %33 = vector.load %arg7[%c0_9, %c896] : memref<16x1152xbf16, #tpu.memory_space<vmem>>, vector<16x128xbf16>
    tpu.vector_store %arg7[%c0_9, %c896], %32 {strides = array<i32>} : memref<16x1152xbf16, #tpu.memory_space<vmem>>, vector<16x128xbf16>,
    %34 = arith.mulf %2, %31 : vector<16x128xf32>
    %35 = arith.subf %34, %27 : vector<16x128xf32>
    %36 = arith.truncf %35 : vector<16x128xf32> to vector<16x128xbf16>
    %c0_10 = arith.constant 0 : index
    %c1024 = arith.constant 1024 : index
    %37 = vector.load %arg7[%c0_10, %c1024] : memref<16x1152xbf16, #tpu.memory_space<vmem>>, vector<16x128xbf16>
    tpu.vector_store %arg7[%c0_10, %c1024], %36 {strides = array<i32>} : memref<16x1152xbf16, #tpu.memory_space<vmem>>, vector<16x128xbf16>,
    %c0_11 = arith.constant 0 : index
    %c0_12 = arith.constant 0 : index
    %38 = vector.load %arg7[%c0_11, %c0_12] : memref<16x1152xbf16, #tpu.memory_space<vmem>>, vector<16x1152xbf16>
    %c0_13 = arith.constant 0 : index
    %c0_14 = arith.constant 0 : index
    %39 = vector.load %arg2[%c0_13, %c0_14] : memref<1152x128xbf16, #tpu.memory_space<vmem>>, vector<1152x128xbf16>
    %cst_15 = arith.constant dense<0.000000e+00> : vector<16x128xf32>
    %40 = tpu.matmul %38, %39, %cst_15 {dimension_numbers = #tpu.dot_dimension_numbers<[1], [0], [0], [1], [0, 0, 1, 1], [], []>} : vector<16x1152xbf16>, vector<1152x128xbf16>, vector<16x128xf32> -> vector<16x128xf32>
    %c0_16 = arith.constant 0 : index
    %c0_17 = arith.constant 0 : index
    %41 = vector.load %arg3[%c0_16, %c0_17] : memref<1x128xf32, #tpu.memory_space<vmem>>, vector<1x128xf32>
    %42 = vector.broadcast %41 : vector<1x128xf32> to vector<16x128xf32>
    %43 = arith.addf %40, %42 : vector<16x128xf32>
    %44 = math.tanh %43 : vector<16x128xf32>
    %45 = arith.addf %44, %44 : vector<16x128xf32>
    %46 = arith.truncf %44 : vector<16x128xf32> to vector<16x128xbf16>
    %c0_18 = arith.constant 0 : index
    %c0_19 = arith.constant 0 : index
    %47 = vector.load %arg8[%c0_18, %c0_19] : memref<16x1152xbf16, #tpu.memory_space<vmem>>, vector<16x128xbf16>
    tpu.vector_store %arg8[%c0_18, %c0_19], %46 {strides = array<i32>} : memref<16x1152xbf16, #tpu.memory_space<vmem>>, vector<16x128xbf16>,
    %48 = arith.mulf %45, %44 : vector<16x128xf32>
    %cst_20 = arith.constant 1.000000e+00 : f32
    %49 = vector.broadcast %cst_20 : f32 to vector<16x128xf32>
    %50 = arith.subf %48, %49 : vector<16x128xf32>
    %51 = arith.truncf %50 : vector<16x128xf32> to vector<16x128xbf16>
    %c0_21 = arith.constant 0 : index
    %c128_22 = arith.constant 128 : index
    %52 = vector.load %arg8[%c0_21, %c128_22] : memref<16x1152xbf16, #tpu.memory_space<vmem>>, vector<16x128xbf16>
    tpu.vector_store %arg8[%c0_21, %c128_22], %51 {strides = array<i32>} : memref<16x1152xbf16, #tpu.memory_space<vmem>>, vector<16x128xbf16>,
    %53 = arith.mulf %45, %50 : vector<16x128xf32>
    %54 = arith.subf %53, %44 : vector<16x128xf32>
    %55 = arith.truncf %54 : vector<16x128xf32> to vector<16x128xbf16>
    %c0_23 = arith.constant 0 : index
    %c256_24 = arith.constant 256 : index
    %56 = vector.load %arg8[%c0_23, %c256_24] : memref<16x1152xbf16, #tpu.memory_space<vmem>>, vector<16x128xbf16>
    tpu.vector_store %arg8[%c0_23, %c256_24], %55 {strides = array<i32>} : memref<16x1152xbf16, #tpu.memory_space<vmem>>, vector<16x128xbf16>,
    %57 = arith.mulf %45, %54 : vector<16x128xf32>
    %58 = arith.subf %57, %50 : vector<16x128xf32>
    %59 = arith.truncf %58 : vector<16x128xf32> to vector<16x128xbf16>
    %c0_25 = arith.constant 0 : index
    %c384_26 = arith.constant 384 : index
    %60 = vector.load %arg8[%c0_25, %c384_26] : memref<16x1152xbf16, #tpu.memory_space<vmem>>, vector<16x128xbf16>
    tpu.vector_store %arg8[%c0_25, %c384_26], %59 {strides = array<i32>} : memref<16x1152xbf16, #tpu.memory_space<vmem>>, vector<16x128xbf16>,
    %61 = arith.mulf %45, %58 : vector<16x128xf32>
    %62 = arith.subf %61, %54 : vector<16x128xf32>
    %63 = arith.truncf %62 : vector<16x128xf32> to vector<16x128xbf16>
    %c0_27 = arith.constant 0 : index
    %c512_28 = arith.constant 512 : index
    %64 = vector.load %arg8[%c0_27, %c512_28] : memref<16x1152xbf16, #tpu.memory_space<vmem>>, vector<16x128xbf16>
    tpu.vector_store %arg8[%c0_27, %c512_28], %63 {strides = array<i32>} : memref<16x1152xbf16, #tpu.memory_space<vmem>>, vector<16x128xbf16>,
    %65 = arith.mulf %45, %62 : vector<16x128xf32>
    %66 = arith.subf %65, %58 : vector<16x128xf32>
    %67 = arith.truncf %66 : vector<16x128xf32> to vector<16x128xbf16>
    %c0_29 = arith.constant 0 : index
    %c640_30 = arith.constant 640 : index
    %68 = vector.load %arg8[%c0_29, %c640_30] : memref<16x1152xbf16, #tpu.memory_space<vmem>>, vector<16x128xbf16>
    tpu.vector_store %arg8[%c0_29, %c640_30], %67 {strides = array<i32>} : memref<16x1152xbf16, #tpu.memory_space<vmem>>, vector<16x128xbf16>,
    %69 = arith.mulf %45, %66 : vector<16x128xf32>
    %70 = arith.subf %69, %62 : vector<16x128xf32>
    %71 = arith.truncf %70 : vector<16x128xf32> to vector<16x128xbf16>
    %c0_31 = arith.constant 0 : index
    %c768_32 = arith.constant 768 : index
    %72 = vector.load %arg8[%c0_31, %c768_32] : memref<16x1152xbf16, #tpu.memory_space<vmem>>, vector<16x128xbf16>
    tpu.vector_store %arg8[%c0_31, %c768_32], %71 {strides = array<i32>} : memref<16x1152xbf16, #tpu.memory_space<vmem>>, vector<16x128xbf16>,
    %73 = arith.mulf %45, %70 : vector<16x128xf32>
    %74 = arith.subf %73, %66 : vector<16x128xf32>
    %75 = arith.truncf %74 : vector<16x128xf32> to vector<16x128xbf16>
    %c0_33 = arith.constant 0 : index
    %c896_34 = arith.constant 896 : index
    %76 = vector.load %arg8[%c0_33, %c896_34] : memref<16x1152xbf16, #tpu.memory_space<vmem>>, vector<16x128xbf16>
    tpu.vector_store %arg8[%c0_33, %c896_34], %75 {strides = array<i32>} : memref<16x1152xbf16, #tpu.memory_space<vmem>>, vector<16x128xbf16>,
    %77 = arith.mulf %45, %74 : vector<16x128xf32>
    %78 = arith.subf %77, %70 : vector<16x128xf32>
    %79 = arith.truncf %78 : vector<16x128xf32> to vector<16x128xbf16>
    %c0_35 = arith.constant 0 : index
    %c1024_36 = arith.constant 1024 : index
    %80 = vector.load %arg8[%c0_35, %c1024_36] : memref<16x1152xbf16, #tpu.memory_space<vmem>>, vector<16x128xbf16>
    tpu.vector_store %arg8[%c0_35, %c1024_36], %79 {strides = array<i32>} : memref<16x1152xbf16, #tpu.memory_space<vmem>>, vector<16x128xbf16>,
    %c0_37 = arith.constant 0 : index
    %c0_38 = arith.constant 0 : index
    %81 = vector.load %arg8[%c0_37, %c0_38] : memref<16x1152xbf16, #tpu.memory_space<vmem>>, vector<16x1152xbf16>
    %c0_39 = arith.constant 0 : index
    %c0_40 = arith.constant 0 : index
    %82 = vector.load %arg4[%c0_39, %c0_40] : memref<1152x128xbf16, #tpu.memory_space<vmem>>, vector<1152x128xbf16>
    %cst_41 = arith.constant dense<0.000000e+00> : vector<16x128xf32>
    %83 = tpu.matmul %81, %82, %cst_41 {dimension_numbers = #tpu.dot_dimension_numbers<[1], [0], [0], [1], [0, 0, 1, 1], [], []>} : vector<16x1152xbf16>, vector<1152x128xbf16>, vector<16x128xf32> -> vector<16x128xf32>
    %c0_42 = arith.constant 0 : index
    %c0_43 = arith.constant 0 : index
    %84 = vector.load %arg5[%c0_42, %c0_43] : memref<1x128xf32, #tpu.memory_space<vmem>>, vector<1x128xf32>
    %85 = vector.broadcast %84 : vector<1x128xf32> to vector<16x128xf32>
    %86 = arith.addf %83, %85 : vector<16x128xf32>
    %c0_44 = arith.constant 0 : index
    %c0_45 = arith.constant 0 : index
    %87 = vector.load %arg6[%c0_44, %c0_45] : memref<16x128xf32, #tpu.memory_space<vmem>>, vector<16x128xf32>
    tpu.vector_store %arg6[%c0_44, %c0_45], %86 {strides = array<i32>} : memref<16x128xf32, #tpu.memory_space<vmem>>, vector<16x128xf32>,
    return
  }
  func.func @transform_0(%arg0: i32) -> (i32, i32) {
    %c0_i32 = arith.constant 0 : i32
    %c0_i32_0 = arith.constant 0 : i32
    return %arg0, %c0_i32 : i32, i32
  }
  func.func @transform_1(%arg0: i32) -> (i32, i32) {
    %c0_i32 = arith.constant 0 : i32
    %c0_i32_0 = arith.constant 0 : i32
    %c0_i32_1 = arith.constant 0 : i32
    return %c0_i32, %c0_i32_0 : i32, i32
  }
  func.func @transform_2(%arg0: i32) -> (i32, i32) {
    %c0_i32 = arith.constant 0 : i32
    %c0_i32_0 = arith.constant 0 : i32
    %c0_i32_1 = arith.constant 0 : i32
    return %c0_i32, %c0_i32_0 : i32, i32
  }
  func.func @transform_3(%arg0: i32) -> (i32, i32) {
    %c0_i32 = arith.constant 0 : i32
    %c0_i32_0 = arith.constant 0 : i32
    %c0_i32_1 = arith.constant 0 : i32
    return %c0_i32, %c0_i32_0 : i32, i32
  }
  func.func @transform_4(%arg0: i32) -> (i32, i32) {
    %c0_i32 = arith.constant 0 : i32
    %c0_i32_0 = arith.constant 0 : i32
    %c0_i32_1 = arith.constant 0 : i32
    return %c0_i32, %c0_i32_0 : i32, i32
  }
  func.func @transform_5(%arg0: i32) -> (i32, i32) {
    %c0_i32 = arith.constant 0 : i32
    %c0_i32_0 = arith.constant 0 : i32
    return %arg0, %c0_i32 : i32, i32
  }
}

</mosaic_0001>

<bundles_post_ra>
// kernel: chebykan_forward.1
= control target key start
LH: loop header
LB: loop body
LE: loop exit
PB: predicated region body
PF: predicated region fallthrough
CT: control target
= control target key end

     0   :  { %vm2310_vm0 = vmmov 0   ;;  %s2880_s0 = inlined_call_operand.vmem [shape: f32[16,128], index: 0, kind: input, shape index: {}]   ;;  %s2881_s1 = inlined_call_operand.vmem [shape: bf16[1152,128], index: 1, kind: input, shape index: {}]   ;;  %s2882_s2 = inlined_call_operand.vmem [shape: f32[1,128], index: 2, kind: input, shape index: {}]   ;;  %s2883_s3 = inlined_call_operand.vmem [shape: bf16[1152,128], index: 3, kind: input, shape index: {}]   ;;  %s2884_s4 = inlined_call_operand.vmem [shape: f32[1,128], index: 4, kind: input, shape index: {}]   ;;  %s2885_s5 = inlined_call_operand.hbm [shape: f32[16,128], index: 5, kind: output, shape index: {}]  }
   0x1   :  { %v2133_v0 = vld [vmem:[%s2881_s1 + $0x40] sm:$0xff]   ;;  %v2137_v4 = vld [vmem:[%s2881_s1 + $0x48] sm:$0xff]   ;;  %v2141_v8 = vld [vmem:[%s2881_s1 + $0x50] sm:$0xff]  }
   0x2   :  { %v2134_v1 = vld [vmem:[%s2881_s1] sm:$0xff]   ;;  %1894 = vmatprep.subr.bf16.mxu0 %v2133_v0  ;;  %v2138_v5 = vld [vmem:[%s2881_s1 + $0x8] sm:$0xff]   ;;  %v2142_v9 = vld [vmem:[%s2881_s1 + $0x10] sm:$0xff]  }
   0x3   :  { %v2135_v2 = vld [vmem:[%s2881_s1 + $0xc0] sm:$0xff]   ;;  %1895 = vmatpush3.bf16.msra.mxu0 %v2134_v1  ;;  %v2139_v6 = vld [vmem:[%s2881_s1 + $0xc8] sm:$0xff]   ;;  %v2143_v10 = vld [vmem:[%s2881_s1 + $0xd0] sm:$0xff]  }
   0x4   :  { %v2136_v3 = vld [vmem:[%s2881_s1 + $0x80] sm:$0xff]   ;;  %1916 = vmatprep.subr.bf16.mxu1 %v2135_v2  ;;  %1896 = vmatprep.subr.bf16.mxu0 %v2137_v4  ;;  %v2140_v7 = vld [vmem:[%s2881_s1 + $0x88] sm:$0xff]   ;;  %v2144_v11 = vld [vmem:[%s2881_s1 + $0x90] sm:$0xff]  }
   0x5   :  { %1917 = vmatpush3.bf16.msra.mxu1 %v2136_v3  ;;  %v2145_v12 = vld [vmem:[%s2881_s1 + $0x58] sm:$0xff]   ;;  %v2149_v16 = vld [vmem:[%s2881_s1 + $0x60] sm:$0xff]   ;;  %v2153_v20 = vld [vmem:[%s2881_s1 + $0x68] sm:$0xff]  }
   0x6   :  { %1918 = vmatprep.subr.bf16.mxu1 %v2139_v6  ;;  %v2146_v13 = vld [vmem:[%s2881_s1 + $0x18] sm:$0xff]   ;;  %v2150_v17 = vld [vmem:[%s2881_s1 + $0x20] sm:$0xff]   ;;  %v2154_v21 = vld [vmem:[%s2881_s1 + $0x28] sm:$0xff]  }
   0x7   :  { %1897 = vmatpush3.bf16.msra.mxu0 %v2138_v5  ;;  %v2147_v14 = vld [vmem:[%s2881_s1 + $0xd8] sm:$0xff]   ;;  %v2151_v18 = vld [vmem:[%s2881_s1 + $0xe0] sm:$0xff]   ;;  %v2155_v22 = vld [vmem:[%s2881_s1 + $0xe8] sm:$0xff]  }
   0x8   :  { %1898 = vmatprep.subr.bf16.mxu0 %v2141_v8  ;;  %v2148_v15 = vld [vmem:[%s2881_s1 + $0x98] sm:$0xff]   ;;  %v2152_v19 = vld [vmem:[%s2881_s1 + $0xa0] sm:$0xff]   ;;  %v2156_v23 = vld [vmem:[%s2881_s1 + $0xa8] sm:$0xff]  }
   0x9   :  { %1919 = vmatpush3.bf16.msra.mxu1 %v2140_v7  ;;  %v2157_v24 = vld [vmem:[%s2881_s1 + $0x70] sm:$0xff]   ;;  %v2161_v28 = vld [vmem:[%s2881_s1 + $0x78] sm:$0xff]   ;;  %v22_v31 = vld [vmem:[%s2880_s0] sm:$0xff] }
   0xa   :  { %1920 = vmatprep.subr.bf16.mxu1 %v2143_v10  ;;  %v2158_v25 = vld [vmem:[%s2881_s1 + $0x30] sm:$0xff]   ;;  %v2162_v29 = vld [vmem:[%s2881_s1 + $0x38] sm:$0xff]   ;;  %v23_v32 = vld [vmem:[%s2880_s0 + $0x8] sm:$0xff]  ;;  %2277 = vtanh.f32 %v22_v31 }
   0xb   :  { %1899 = vmatpush3.bf16.msra.mxu0 %v2142_v9  ;;  %v2159_v26 = vld [vmem:[%s2881_s1 + $0xf0] sm:$0xff]   ;;  %v2163_v30 = vld [vmem:[%s2881_s1 + $0xf8] sm:$0xff]   ;;  %2279 = vtanh.f32 %v23_v32  ;;  %v2165_v34 = vld [vmem:[%s2881_s1 + $0x140] sm:$0xff]  }
   0xc   :  { %1900 = vmatprep.subr.bf16.mxu0 %v2145_v12  ;;  %v2160_v27 = vld [vmem:[%s2881_s1 + $0xb0] sm:$0xff]   ;;  %v2164_v33 = vld [vmem:[%s2881_s1 + $0xb8] sm:$0xff]   ;;  %v2167_v35 = vld [vmem:[%s2881_s1 + $0x1c0] sm:$0xff]  }
   0xd   :  { %1921 = vmatpush3.bf16.msra.mxu1 %v2144_v11  ;;  %v2166_v48 = vld [vmem:[%s2881_s1 + $0x100] sm:$0xff]   ;;  %v2169_v50 = vld [vmem:[%s2881_s1 + $0x148] sm:$0xff]   ;;  %v2173_v56 = vld [vmem:[%s2881_s1 + $0x150] sm:$0xff]  }
   0xe   :  { %1922 = vmatprep.subr.bf16.mxu1 %v2147_v14  ;;  %v2170_v54 = vld [vmem:[%s2881_s1 + $0x108] sm:$0xff]   ;;  %v2168_v58 = vld [vmem:[%s2881_s1 + $0x180] sm:$0xff]   ;;  %v2174_v0 = vld [vmem:[%s2881_s1 + $0x110] sm:$0xff]  }
   0xf   :  { %1901 = vmatpush3.bf16.msra.mxu0 %v2146_v13  ;;  %v2171_v61 = vld [vmem:[%s2881_s1 + $0x1c8] sm:$0xff]   ;;  %v2177_v2 = vld [vmem:[%s2881_s1 + $0x158] sm:$0xff]   ;;  %v2175_v5 = vld [vmem:[%s2881_s1 + $0x1d0] sm:$0xff]  }
  0x10   :  { %1902 = vmatprep.subr.bf16.mxu0 %v2149_v16  ;;  %v2172_v4 = vld [vmem:[%s2881_s1 + $0x188] sm:$0xff]   ;;  %v2178_v7 = vld [vmem:[%s2881_s1 + $0x118] sm:$0xff]   ;;  %v2181_v9 = vld [vmem:[%s2881_s1 + $0x160] sm:$0xff]  }
  0x11   :  { %1923 = vmatpush3.bf16.msra.mxu1 %v2148_v15  ;;  %v2176_v11 = vld [vmem:[%s2881_s1 + $0x190] sm:$0xff]   ;;  %v2179_v13 = vld [vmem:[%s2881_s1 + $0x1d8] sm:$0xff]   ;;  %v2182_v15 = vld [vmem:[%s2881_s1 + $0x120] sm:$0xff]  }
  0x12   :  { %1924 = vmatprep.subr.bf16.mxu1 %v2151_v18  ;;  %v2185_v18 = vld [vmem:[%s2881_s1 + $0x168] sm:$0xff]   ;;  %v2193_v32 = vld [vmem:[%s2881_s1 + $0x178] sm:$0xff]  }
  0x13   :  { %1903 = vmatpush3.bf16.msra.mxu0 %v2150_v17  ;;  %v2187_v31 = vld [vmem:[%s2881_s1 + $0x1e8] sm:$0xff]  }
  0x14   :  { %1904 = vmatprep.subr.bf16.mxu0 %v2153_v20  ;;  %v2278_v36 = vpop.eup %2277  ;;  %v2180_v20 = vld [vmem:[%s2881_s1 + $0x198] sm:$0xff]  }
  0x15   :  { %1925 = vmatpush3.bf16.msra.mxu1 %v2152_v19  ;;  %v2280_v37 = vpop.eup %2279  ;;  %v2452_v38 = vadd.f32 %v2278_v36, %v2278_v36 }
  0x16   :  { %1926 = vmatprep.subr.bf16.mxu1 %v2155_v22  ;;  %v2454_v39 = vadd.f32 %v2280_v37, %v2280_v37  ;;  %v28_v45 = vpack.c.bf16 %v2280_v37, %v2278_v36  ;;  %v2183_v22 = vld [vmem:[%s2881_s1 + $0x1e0] sm:$0xff]  }
  0x17   :  { %1905 = vmatpush3.bf16.msra.mxu0 %v2154_v21  ;;  %v30_v40 = vmul.f32 %v2278_v36, %v2452_v38 }
  0x18   :  { %1906 = vmatprep.subr.bf16.mxu0 %v2157_v24  ;;  %v31_v41 = vmul.f32 %v2280_v37, %v2454_v39  ;;  %v2186_v24 = vld [vmem:[%s2881_s1 + $0x128] sm:$0xff]  }
  0x19   :  { %1927 = vmatpush3.bf16.msra.mxu1 %v2156_v23  ;;  %v1744_v42 = vadd.f32 -1.0, %v30_v40  ;;  %v2194_v40 = vld [vmem:[%s2881_s1 + $0x138] sm:$0xff]  }
  0x1a   :  { %1928 = vmatprep.subr.bf16.mxu1 %v2159_v26  ;;  %v1745_v43 = vadd.f32 -1.0, %v31_v41  ;;  %v2189_v26 = vld [vmem:[%s2881_s1 + $0x170] sm:$0xff]  }
  0x1b   :  { %1907 = vmatpush3.bf16.msra.mxu0 %v2158_v25  ;;  %v36_v44 = vmul.f32 %v1744_v42, %v2452_v38 }
  0x1c   :  { %1908 = vmatprep.subr.bf16.mxu0 %v2161_v28  ;;  %v34_v46 = vpack.c.bf16 %v1745_v43, %v1744_v42  ;;  %v37_v47 = vmul.f32 %v1745_v43, %v2454_v39  ;;  %v2184_v28 = vld [vmem:[%s2881_s1 + $0x1a0] sm:$0xff]  }
  0x1d   :  { %1929 = vmatpush3.bf16.msra.mxu1 %v2160_v27  ;;  %v38_v49 = vsub.f32 %v36_v44, %v2278_v36  ;;  %v2195_v44 = vld [vmem:[%s2881_s1 + $0x1f8] sm:$0xff]  }
  0x1e   :  { %1930 = vmatprep.subr.bf16.mxu1 %v2163_v30  ;;  %702 = vmatprep.mubr.bf16.mxu0 %v34_v46  ;;  %v39_v51 = vsub.f32 %v37_v47, %v2280_v37  ;;  %v2188_v37 = vld [vmem:[%s2881_s1 + $0x1a8] sm:$0xff]   ;;  %v2309_v46 = vmov 0.0   ;;  %v2196_v47 = vld [vmem:[%s2881_s1 + $0x1b8] sm:$0xff]  }
  0x1f   :  { %1909 = vmatpush3.bf16.msra.mxu0 %v2162_v29  ;;  %v42_v52 = vmul.f32 %v38_v49, %v2452_v38  ;;  %v2190_v29 = vld [vmem:[%s2881_s1 + $0x130] sm:$0xff]  }
  0x20   :  { %1938 = vmatprep.subr.bf16.mxu0 %v2165_v34  ;;  %v43_v53 = vmul.f32 %v39_v51, %v2454_v39  ;;  %v40_v60 = vpack.c.bf16 %v39_v51, %v38_v49 }
  0x21   :  { %1931 = vmatpush3.bf16.msra.mxu1 %v2164_v33  ;;  %v44_v55 = vsub.f32 %v42_v52, %v1744_v42  ;;  %v2192_v42 = vld [vmem:[%s2881_s1 + $0x1b0] sm:$0xff]   ;;  %v2201_v52 = vld [vmem:[%s2881_s1 + $0x220] sm:$0xff]  }
  0x22   :  { %1960 = vmatprep.subr.bf16.mxu1 %v2167_v35  ;;  %703 = vmatmul.mubr.bf16.vlgmr.msra.gmra.mrb[0].mxu0 %v28_v45  ;;  %v45_v57 = vsub.f32 %v43_v53, %v1745_v43  ;;  %v2197_v43 = vld [vmem:[%s2881_s1 + $0x200] sm:$0xff]   ;;  %v2202_v53 = vld [vmem:[%s2881_s1 + $0x228] sm:$0xff]  }
  0x23   :  { %1939 = vmatpush3.bf16.msra.mxu0 %v2166_v48  ;;  %v48_v59 = vmul.f32 %v44_v55, %v2452_v38  ;;  %v2198_v48 = vld [vmem:[%s2881_s1 + $0x208] sm:$0xff]  }
  0x24   :  { %1940 = vmatprep.subr.bf16.mxu0 %v2169_v50  ;;  %v46_v62 = vpack.c.bf16 %v45_v57, %v44_v55  ;;  %v49_v63 = vmul.f32 %v45_v57, %v2454_v39 }
  0x25   :  { %v2485_v1 = vsub.f32 %v48_v59, %v38_v49  ;;  %v2199_v49 = vld [vmem:[%s2881_s1 + $0x210] sm:$0xff]  }
  0x26   :  { %v2490_v3 = vsub.f32 %v49_v63, %v39_v51  ;;  %743 = vmatprep.mubr.bf16.mxu1 %v46_v62  ;;  %v2200_v51 = vld [vmem:[%s2881_s1 + $0x218] sm:$0xff]  }
  0x27   :  { %1941 = vmatpush3.bf16.msra.mxu0 %v2170_v54  ;;  %744 = vmatmul.mubr.bf16.vlgmr.msra.gmra.mrb[0].mxu1 %v40_v60  ;;  %v54_v6 = vmul.f32 %v2485_v1, %v2452_v38  ;;  %v2203_v54 = vld [vmem:[%s2881_s1 + $0x230] sm:$0xff]  }
  0x28   :  { %1942 = vmatprep.subr.bf16.mxu0 %v2173_v56  ;;  %1961 = vmatpush3.bf16.msra.mxu1 %v2168_v58  ;;  %v55_v8 = vmul.f32 %v2490_v3, %v2454_v39  ;;  %v52_v45 = vpack.c.bf16 %v2490_v3, %v2485_v1 }
  0x29   :  { %1962 = vmatprep.subr.bf16.mxu1 %v2171_v61  ;;  %v56_v10 = vsub.f32 %v54_v6, %v44_v55  ;;  %v2204_v55 = vld [vmem:[%s2881_s1 + $0x238] sm:$0xff]  }
  0x2a   :  { %v57_v12 = vsub.f32 %v55_v8, %v45_v57 }
  0x2b   :  { %1943 = vmatpush3.bf16.msra.mxu0 %v2174_v0  ;;  %v60_v14 = vmul.f32 %v56_v10, %v2452_v38 }
  0x2c   :  { %1944 = vmatprep.subr.bf16.mxu0 %v2177_v2  ;;  %1963 = vmatpush3.bf16.msra.mxu1 %v2172_v4  ;;  %v58_v16 = vpack.c.bf16 %v57_v12, %v56_v10  ;;  %v61_v17 = vmul.f32 %v57_v12, %v2454_v39 }
  0x2d   :  { %1964 = vmatprep.subr.bf16.mxu1 %v2175_v5  ;;  %v62_v19 = vsub.f32 %v60_v14, %v2485_v1 }
  0x2e   :  { %784 = vmatprep.mubr.bf16.mxu0 %v58_v16  ;;  %v63_v21 = vsub.f32 %v61_v17, %v2490_v3 }
  0x2f   :  { %1945 = vmatpush3.bf16.msra.mxu0 %v2178_v7  ;;  %v66_v23 = vmul.f32 %v62_v19, %v2452_v38 }
  0x30   :  { %1946 = vmatprep.subr.bf16.mxu0 %v2181_v9  ;;  %1965 = vmatpush3.bf16.msra.mxu1 %v2176_v11  ;;  %v67_v25 = vmul.f32 %v63_v21, %v2454_v39  ;;  %v64_v50 = vpack.c.bf16 %v63_v21, %v62_v19 }
  0x31   :  { %1966 = vmatprep.subr.bf16.mxu1 %v2179_v13  ;;  %v68_v27 = vsub.f32 %v66_v23, %v56_v10 }
  0x32   :  { %v69_v30 = vsub.f32 %v67_v25, %v57_v12 }
  0x33   :  { %1947 = vmatpush3.bf16.msra.mxu0 %v2182_v15  ;;  %v72_v33 = vmul.f32 %v68_v27, %v2452_v38  ;;  %v2191_v38 = vld [vmem:[%s2881_s1 + $0x1f0] sm:$0xff]  }
  0x34   :  { %1948 = vmatprep.subr.bf16.mxu0 %v2185_v18  ;;  %1967 = vmatpush3.bf16.msra.mxu1 %v2180_v20  ;;  %v70_v34 = vpack.c.bf16 %v69_v30, %v68_v27  ;;  %v73_v35 = vmul.f32 %v69_v30, %v2454_v39 }
  0x35   :  { %1968 = vmatprep.subr.bf16.mxu1 %v2183_v22  ;;  %v74_v36 = vsub.f32 %v72_v33, %v62_v19 }
  0x36   :  { %825 = vmatprep.mubr.bf16.mxu1 %v70_v34  ;;  %v75_v41 = vsub.f32 %v73_v35, %v63_v21 }
  0x37   :  { %1949 = vmatpush3.bf16.msra.mxu0 %v2186_v24 }
  0x38   :  { %1950 = vmatprep.subr.bf16.mxu0 %v2189_v26  ;;  %1969 = vmatpush3.bf16.msra.mxu1 %v2184_v28  ;;  %v76_v39 = vpack.c.bf16 %v75_v41, %v74_v36 }
  0x39   :  { %1970 = vmatprep.subr.bf16.mxu1 %v2187_v31 }
  0x3b   :  { %1951 = vmatpush3.bf16.msra.mxu0 %v2190_v29 }
  0x3c   :  { %1952 = vmatprep.subr.bf16.mxu0 %v2193_v32  ;;  %1971 = vmatpush3.bf16.msra.mxu1 %v2188_v37 }
  0x3d   :  { %1972 = vmatprep.subr.bf16.mxu1 %v2191_v38 }
  0x3f   :  { %1953 = vmatpush3.bf16.msra.mxu0 %v2194_v40 }
  0x40   :  { %2088 = vmatprep.subr.bf16.mxu0 %v2309_v46  ;;  %1973 = vmatpush3.bf16.msra.mxu1 %v2192_v42 }
  0x41   :  { %1974 = vmatprep.subr.bf16.mxu1 %v2195_v44 }
  0x42   :  { %785 = vmatmul.mubr.bf16.vlgmr.msra.gmra.mrb[4].mxu0 %v52_v45 }
  0x43   :  { %2089 = vmatpush3.bf16.msra.mxu0 %v2197_v43  ;;  %2104 = vmatprep.mubr.msk.bf16.mxu0 %vm2310_vm0, %v2309_v46 }
  0x44   :  { %2090 = vmatprep.subr.bf16.mxu0 %v2309_v46  ;;  %1975 = vmatpush3.bf16.msra.mxu1 %v2196_v47 }
  0x47   :  { %2091 = vmatpush3.bf16.msra.mxu0 %v2198_v48  ;;  %826 = vmatmul.mubr.bf16.vlgmr.msra.gmra.mrb[4].mxu1 %v64_v50 }
  0x48   :  { %2092 = vmatprep.subr.bf16.mxu0 %v2309_v46 }
  0x4b   :  { %2093 = vmatpush3.bf16.msra.mxu0 %v2199_v49 }
  0x4c   :  { %2094 = vmatprep.subr.bf16.mxu0 %v2309_v46 }
  0x4f   :  { %2095 = vmatpush3.bf16.msra.mxu0 %v2200_v51 }
  0x50   :  { %2096 = vmatprep.subr.bf16.mxu0 %v2309_v46 }
  0x53   :  { %2097 = vmatpush3.bf16.msra.mxu0 %v2201_v52 }
  0x54   :  { %2098 = vmatprep.subr.bf16.mxu0 %v2309_v46 }
  0x57   :  { %2099 = vmatpush3.bf16.msra.mxu0 %v2202_v53 }
  0x58   :  { %2100 = vmatprep.subr.bf16.mxu0 %v2309_v46 }
  0x5b   :  { %2101 = vmatpush3.bf16.msra.mxu0 %v2203_v54 }
  0x5c   :  { %2102 = vmatprep.subr.bf16.mxu0 %v2309_v46 }
  0x5f   :  { %2103 = vmatpush3.bf16.msra.mxu0 %v2204_v55 }
  0x62   :  { %2105 = vmatmul.mubr.bf16.vlgmr.msra.gmra.mrb[8].mxu0 %v76_v39 }
  0x63   :  { %10 = vsyncpa [#allocation5], 0  ;;  %v2205_v56 = vld [vmem:[%s2883_s3 + $0x40] sm:$0xff]   ;;  %v2207_v58 = vld [vmem:[%s2883_s3 + $0x48] sm:$0xff]  }
  0x64   :  { %v2206_v57 = vld [vmem:[%s2883_s3] sm:$0xff]   ;;  %1991 = vmatprep.subr.bf16.mxu1 %v2205_v56  ;;  %v2208_v59 = vld [vmem:[%s2883_s3 + $0x8] sm:$0xff]   ;;  %v2209_v60 = vld [vmem:[%s2883_s3 + $0x50] sm:$0xff]  }
  0x65   :  { %1992 = vmatpush3.bf16.msra.mxu1 %v2206_v57  ;;  %v2210_v61 = vld [vmem:[%s2883_s3 + $0xc0] sm:$0xff]   ;;  %v2211_v62 = vld [vmem:[%s2883_s3 + $0x10] sm:$0xff]   ;;  %v2213_v0 = vld [vmem:[%s2883_s3 + $0x58] sm:$0xff]  }
  0x66   :  { %1993 = vmatprep.subr.bf16.mxu1 %v2207_v58  ;;  %v2212_v63 = vld [vmem:[%s2883_s3 + $0x80] sm:$0xff]   ;;  %2013 = vmatprep.subr.bf16.mxu0 %v2210_v61  ;;  %v2214_v1 = vld [vmem:[%s2883_s3 + $0xc8] sm:$0xff]   ;;  %v2215_v2 = vld [vmem:[%s2883_s3 + $0x18] sm:$0xff]  }
  0x67   :  { %2014 = vmatpush3.bf16.msra.mxu0 %v2212_v63  ;;  %v2216_v3 = vld [vmem:[%s2883_s3 + $0x88] sm:$0xff]   ;;  %v2217_v4 = vld [vmem:[%s2883_s3 + $0x60] sm:$0xff]   ;;  %v2218_v5 = vld [vmem:[%s2883_s3 + $0xd0] sm:$0xff]  }
  0x68   :  { %2015 = vmatprep.subr.bf16.mxu0 %v2214_v1  ;;  %v2219_v6 = vld [vmem:[%s2883_s3 + $0x20] sm:$0xff]   ;;  %v2220_v7 = vld [vmem:[%s2883_s3 + $0x90] sm:$0xff]   ;;  %v2221_v8 = vld [vmem:[%s2883_s3 + $0x68] sm:$0xff]  }
  0x69   :  { %1994 = vmatpush3.bf16.msra.mxu1 %v2208_v59  ;;  %v2222_v9 = vld [vmem:[%s2883_s3 + $0xd8] sm:$0xff]   ;;  %v2223_v10 = vld [vmem:[%s2883_s3 + $0x28] sm:$0xff]   ;;  %v2225_v12 = vld [vmem:[%s2883_s3 + $0x70] sm:$0xff]  }
  0x6a   :  { %1995 = vmatprep.subr.bf16.mxu1 %v2209_v60  ;;  %v2224_v11 = vld [vmem:[%s2883_s3 + $0x98] sm:$0xff]   ;;  %v2226_v13 = vld [vmem:[%s2883_s3 + $0xe0] sm:$0xff]   ;;  %v2227_v14 = vld [vmem:[%s2883_s3 + $0x30] sm:$0xff]  }
  0x6b   :  { %2016 = vmatpush3.bf16.msra.mxu0 %v2216_v3  ;;  %v2228_v15 = vld [vmem:[%s2883_s3 + $0xa0] sm:$0xff]   ;;  %v2229_v16 = vld [vmem:[%s2883_s3 + $0x78] sm:$0xff]   ;;  %v2230_v17 = vld [vmem:[%s2883_s3 + $0xe8] sm:$0xff]  }
  0x6c   :  { %2017 = vmatprep.subr.bf16.mxu0 %v2218_v5  ;;  %v2231_v18 = vld [vmem:[%s2883_s3 + $0x38] sm:$0xff]   ;;  %v2232_v19 = vld [vmem:[%s2883_s3 + $0xa8] sm:$0xff]   ;;  %v2233_v20 = vld [vmem:[%s2883_s3 + $0xf0] sm:$0xff]  }
  0x6d   :  { %1996 = vmatpush3.bf16.msra.mxu1 %v2211_v62  ;;  %v2234_v21 = vld [vmem:[%s2883_s3 + $0x140] sm:$0xff]   ;;  %v2235_v22 = vld [vmem:[%s2883_s3 + $0xb0] sm:$0xff]   ;;  %v2237_v23 = vld [vmem:[%s2883_s3 + $0xf8] sm:$0xff]  }
  0x6e   :  { %1997 = vmatprep.subr.bf16.mxu1 %v2213_v0  ;;  %v2239_v24 = vld [vmem:[%s2883_s3 + $0xb8] sm:$0xff]   ;;  %v2242_v25 = vld [vmem:[%s2883_s3 + $0x1c0] sm:$0xff]  }
  0x6f   :  { %2018 = vmatpush3.bf16.msra.mxu0 %v2220_v7  ;;  %v1746_v32 = vld [vmem:[%s2882_s2] ss:$0 sm:$0xff] }
  0x70   :  { %2019 = vmatprep.subr.bf16.mxu0 %v2222_v9 }
  0x71   :  { %1998 = vmatpush3.bf16.msra.mxu1 %v2215_v2 }
  0x72   :  { %1999 = vmatprep.subr.bf16.mxu1 %v2217_v4 }
  0x73   :  { %2020 = vmatpush3.bf16.msra.mxu0 %v2224_v11 }
  0x74   :  { %2021 = vmatprep.subr.bf16.mxu0 %v2226_v13 }
  0x75   :  { %2000 = vmatpush3.bf16.msra.mxu1 %v2219_v6 }
  0x76   :  { %2001 = vmatprep.subr.bf16.mxu1 %v2221_v8 }
  0x77   :  { %2022 = vmatpush3.bf16.msra.mxu0 %v2228_v15 }
  0x78   :  { %2023 = vmatprep.subr.bf16.mxu0 %v2230_v17 }
  0x79   :  { %2002 = vmatpush3.bf16.msra.mxu1 %v2223_v10 }
  0x7a   :  { %2003 = vmatprep.subr.bf16.mxu1 %v2225_v12 }
  0x7b   :  { %2024 = vmatpush3.bf16.msra.mxu0 %v2232_v19  ;;  %v2240_v19 = vld [vmem:[%s2883_s3 + $0x108] sm:$0xff]  }
  0x7c   :  { %2025 = vmatprep.subr.bf16.mxu0 %v2233_v20 }
  0x7d   :  { %2004 = vmatpush3.bf16.msra.mxu1 %v2227_v14  ;;  %v2236_v14 = vld [vmem:[%s2883_s3 + $0x100] sm:$0xff]  }
  0x7e   :  { %2005 = vmatprep.subr.bf16.mxu1 %v2229_v16  ;;  %v2238_v16 = vld [vmem:[%s2883_s3 + $0x148] sm:$0xff]  }
  0x7f   :  { %2026 = vmatpush3.bf16.msra.mxu0 %v2235_v22 }
  0x80   :  { %2027 = vmatprep.subr.bf16.mxu0 %v2237_v23  ;;  %v2241_v23 = vld [vmem:[%s2883_s3 + $0x150] sm:$0xff]  }
  0x81   :  { %2006 = vmatpush3.bf16.msra.mxu1 %v2231_v18 }
  0x82   :  { %2035 = vmatprep.subr.bf16.mxu1 %v2234_v21 }
  0x83   :  { %2028 = vmatpush3.bf16.msra.mxu0 %v2239_v24 }
  0x84   :  { %2057 = vmatprep.subr.bf16.mxu0 %v2242_v25 }
  0xf5   :  { %v1910_v26 = vpop.f32.mrb[0].mxu0 }
  0xf6   :  { %v1911_v27 = vpop.f32.mrb[1].mxu0 }
  0xf7   :  { %v1912_v28 = vadd.f32 %v1911_v27, %v1910_v26  ;;  %v1913_v29 = vpop.f32.mrb[2].mxu0 }
  0xf8   :  { %v1914_v30 = vpop.f32.mrb[3].mxu0 }
  0xf9   :  { %v1915_v31 = vadd.f32 %v1914_v30, %v1913_v29  ;;  %v705_v33 = vadd.f32 %v1912_v28, %v1746_v32  ;;  %v2243_v28 = vld [vmem:[%s2883_s3 + $0x110] sm:$0xff]   ;;  %v2244_v29 = vld [vmem:[%s2883_s3 + $0x180] sm:$0xff]  }
  0xfa   :  { %v1932_v34 = vpop.f32.mrb[0].mxu1 }
  0xfb   :  { %v1933_v35 = vpop.f32.mrb[1].mxu1  ;;  %v708_v36 = vadd.f32 %v1915_v31, %v1746_v32  ;;  %v2245_v31 = vld [vmem:[%s2883_s3 + $0x158] sm:$0xff]   ;;  %v2246_v32 = vld [vmem:[%s2883_s3 + $0x1c8] sm:$0xff]  }
  0xfc   :  { %v1934_v37 = vadd.f32 %v1933_v35, %v1932_v34  ;;  %v1935_v40 = vpop.f32.mrb[2].mxu1  ;;  %v2247_v35 = vld [vmem:[%s2883_s3 + $0x118] sm:$0xff]  }
  0xfd   :  { %v1936_v41 = vpop.f32.mrb[3].mxu1 }
  0xfe   :  { %v746_v38 = vadd.f32 %v1934_v37, %v705_v33  ;;  %v1937_v39 = vadd.f32 %v1936_v41, %v1935_v40 }
 0x100   :  { %v749_v42 = vadd.f32 %v1937_v39, %v708_v36  ;;  %v2248_v36 = vld [vmem:[%s2883_s3 + $0x188] sm:$0xff]   ;;  %v2250_v39 = vld [vmem:[%s2883_s3 + $0x1d0] sm:$0xff]  }
 0x115   :  { %v1954_v43 = vpop.f32.mrb[4].mxu0 }
 0x116   :  { %v1955_v44 = vpop.f32.mrb[5].mxu0 }
 0x117   :  { %v1956_v45 = vadd.f32 %v1955_v44, %v1954_v43  ;;  %v1957_v47 = vpop.f32.mrb[6].mxu0 }
 0x118   :  { %v1958_v48 = vpop.f32.mrb[7].mxu0 }
 0x119   :  { %v787_v49 = vadd.f32 %v1956_v45, %v746_v38  ;;  %v1959_v50 = vadd.f32 %v1958_v48, %v1957_v47  ;;  %v2249_v38 = vld [vmem:[%s2883_s3 + $0x160] sm:$0xff]   ;;  %v2252_v48 = vld [vmem:[%s2883_s3 + $0x190] sm:$0xff]  }
 0x11a   :  { %v1976_v52 = vpop.f32.mrb[4].mxu1  ;;  %v2251_v47 = vld [vmem:[%s2883_s3 + $0x120] sm:$0xff]  }
 0x11b   :  { %v790_v51 = vadd.f32 %v1959_v50, %v749_v42  ;;  %v1977_v53 = vpop.f32.mrb[5].mxu1  ;;  %v2253_v50 = vld [vmem:[%s2883_s3 + $0x168] sm:$0xff]  }
 0x11c   :  { %v1978_v54 = vadd.f32 %v1977_v53, %v1976_v52  ;;  %v1979_v55 = vpop.f32.mrb[6].mxu1 }
 0x11d   :  { %v1980_v56 = vpop.f32.mrb[7].mxu1 }
 0x11e   :  { %v1981_v57 = vadd.f32 %v1980_v56, %v1979_v55  ;;  %v828_v58 = vadd.f32 %v1978_v54, %v787_v49  ;;  %v2255_v54 = vld [vmem:[%s2883_s3 + $0x128] sm:$0xff]   ;;  %v2256_v55 = vld [vmem:[%s2883_s3 + $0x198] sm:$0xff]  }
 0x120   :  { %v831_v59 = vadd.f32 %v1981_v57, %v790_v51  ;;  %v2254_v51 = vld [vmem:[%s2883_s3 + $0x1d8] sm:$0xff]  }
 0x135   :  { %v868_v60 = vpop.f32.mrb[8].mxu0 }
 0x136   :  { %v869_v61 = vadd.f32 %v868_v60, %v828_v58  ;;  %v2106_v62 = vpop.f32.mrb[9].mxu0  ;;  %v2258_v60 = vld [vmem:[%s2883_s3 + $0x1e0] sm:$0xff]  }
 0x137   :  { %v871_v63 = vpop.f32.mrb[10].mxu0 }
 0x138   :  { %2281 = vtanh.f32 %v869_v61  ;;  %v872_v0 = vadd.f32 %v871_v63, %v831_v59  ;;  %v2107_v1 = vpop.f32.mrb[11].mxu0  ;;  %v2257_v59 = vld [vmem:[%s2883_s3 + $0x170] sm:$0xff]  }
 0x139   :  { %v2259_v1 = vld [vmem:[%s2883_s3 + $0x130] sm:$0xff]  }
 0x13a   :  { %2283 = vtanh.f32 %v872_v0 }
 0x142   :  { %v2282_v2 = vpop.eup %2281 }
 0x143   :  { %v2711_v3 = vadd.f32 %v2282_v2, %v2282_v2 }
 0x144   :  { %v2284_v4 = vpop.eup %2283 }
 0x145   :  { %v2713_v5 = vadd.f32 %v2284_v4, %v2284_v4  ;;  %v881_v6 = vmul.f32 %v2282_v2, %v2711_v3  ;;  %v879_v7 = vpack.c.bf16 %v2284_v4, %v2282_v2 }
 0x147   :  { %v882_v8 = vmul.f32 %v2284_v4, %v2713_v5  ;;  %v1819_v9 = vadd.f32 -1.0, %v881_v6  ;;  %v2262_v6 = vld [vmem:[%s2883_s3 + $0x1e8] sm:$0xff]  }
 0x149   :  { %v1820_v10 = vadd.f32 -1.0, %v882_v8  ;;  %v887_v11 = vmul.f32 %v1819_v9, %v2711_v3  ;;  %v2264_v8 = vld [vmem:[%s2883_s3 + $0x1a8] sm:$0xff]  }
 0x14b   :  { %v885_v12 = vpack.c.bf16 %v1820_v10, %v1819_v9  ;;  %v888_v13 = vmul.f32 %v1820_v10, %v2713_v5  ;;  %v889_v15 = vsub.f32 %v887_v11, %v2282_v2  ;;  %v2260_v2 = vld [vmem:[%s2883_s3 + $0x1a0] sm:$0xff]   ;;  %v2266_v11 = vld [vmem:[%s2883_s3 + $0x1b0] sm:$0xff]  }
 0x14d   :  { %1553 = vmatprep.mubr.bf16.mxu1 %v885_v12  ;;  %v890_v17 = vsub.f32 %v888_v13, %v2284_v4  ;;  %v893_v18 = vmul.f32 %v889_v15, %v2711_v3  ;;  %v2267_v12 = vld [vmem:[%s2883_s3 + $0x200] sm:$0xff]   ;;  %v2268_v13 = vld [vmem:[%s2883_s3 + $0x1f8] sm:$0xff]  }
 0x14e   :  { %1554 = vmatmul.mubr.bf16.vlgmr.msra.gmra.mrb[8].mxu1 %v879_v7  ;;  %v2263_v7 = vld [vmem:[%s2883_s3 + $0x138] sm:$0xff]  }
 0x14f   :  { %2036 = vmatpush3.bf16.msra.mxu1 %v2236_v14  ;;  %v894_v20 = vmul.f32 %v890_v17, %v2713_v5  ;;  %v895_v21 = vsub.f32 %v893_v18, %v1819_v9  ;;  %v891_v22 = vpack.c.bf16 %v890_v17, %v889_v15  ;;  %v2269_v14 = vld [vmem:[%s2883_s3 + $0x1b8] sm:$0xff]   ;;  %v2273_v18 = vld [vmem:[%s2883_s3 + $0x220] sm:$0xff]  }
 0x150   :  { %2037 = vmatprep.subr.bf16.mxu1 %v2238_v16  ;;  %v2271_v16 = vld [vmem:[%s2883_s3 + $0x210] sm:$0xff]  }
 0x151   :  { %v896_v24 = vsub.f32 %v894_v20, %v1820_v10  ;;  %v899_v25 = vmul.f32 %v895_v21, %v2711_v3  ;;  %v2265_v10 = vld [vmem:[%s2883_s3 + $0x1f0] sm:$0xff]  }
 0x152   :  { %v2275_v20 = vld [vmem:[%s2883_s3 + $0x230] sm:$0xff]  }
 0x153   :  { %2038 = vmatpush3.bf16.msra.mxu1 %v2240_v19  ;;  %v897_v26 = vpack.c.bf16 %v896_v24, %v895_v21  ;;  %v900_v27 = vmul.f32 %v896_v24, %v2713_v5  ;;  %v2741_v30 = vsub.f32 %v899_v25, %v889_v15  ;;  %v2270_v15 = vld [vmem:[%s2883_s3 + $0x208] sm:$0xff]  }
 0x154   :  { %2039 = vmatprep.subr.bf16.mxu1 %v2241_v23  ;;  %v2274_v19 = vld [vmem:[%s2883_s3 + $0x228] sm:$0xff]  }
 0x155   :  { %1594 = vmatprep.mubr.bf16.mxu0 %v897_v26  ;;  %v2749_v33 = vsub.f32 %v900_v27, %v890_v17  ;;  %v905_v34 = vmul.f32 %v2741_v30, %v2711_v3  ;;  %v2272_v17 = vld [vmem:[%s2883_s3 + $0x218] sm:$0xff]  }
 0x156   :  { %1595 = vmatmul.mubr.bf16.vlgmr.msra.gmra.mrb[12].mxu0 %v891_v22 }
 0x157   :  { %2040 = vmatpush3.bf16.msra.mxu1 %v2243_v28  ;;  %2058 = vmatpush3.bf16.msra.mxu0 %v2244_v29  ;;  %v906_v37 = vmul.f32 %v2749_v33, %v2713_v5  ;;  %v907_v40 = vsub.f32 %v905_v34, %v895_v21  ;;  %v903_v41 = vpack.c.bf16 %v2749_v33, %v2741_v30  ;;  %v2276_v21 = vld [vmem:[%s2883_s3 + $0x238] sm:$0xff]   ;;  %v1821_v28 = vld [vmem:[%s2884_s4] ss:$0 sm:$0xff] }
 0x158   :  { %2041 = vmatprep.subr.bf16.mxu1 %v2245_v31  ;;  %2059 = vmatprep.subr.bf16.mxu0 %v2246_v32 }
 0x159   :  { %v908_v42 = vsub.f32 %v906_v37, %v896_v24  ;;  %v911_v43 = vmul.f32 %v907_v40, %v2711_v3 }
 0x15b   :  { %2042 = vmatpush3.bf16.msra.mxu1 %v2247_v35  ;;  %2060 = vmatpush3.bf16.msra.mxu0 %v2248_v36  ;;  %v909_v44 = vpack.c.bf16 %v908_v42, %v907_v40  ;;  %v912_v45 = vmul.f32 %v908_v42, %v2713_v5  ;;  %v913_v49 = vsub.f32 %v911_v43, %v2741_v30 }
 0x15c   :  { %2043 = vmatprep.subr.bf16.mxu1 %v2249_v38  ;;  %2061 = vmatprep.subr.bf16.mxu0 %v2250_v39 }
 0x15d   :  { %1635 = vmatprep.mubr.bf16.mxu1 %v909_v44  ;;  %v914_v52 = vsub.f32 %v912_v45, %v2749_v33  ;;  %v917_v53 = vmul.f32 %v913_v49, %v2711_v3 }
 0x15f   :  { %2044 = vmatpush3.bf16.msra.mxu1 %v2251_v47  ;;  %2062 = vmatpush3.bf16.msra.mxu0 %v2252_v48  ;;  %v918_v56 = vmul.f32 %v914_v52, %v2713_v5  ;;  %v919_v57 = vsub.f32 %v917_v53, %v907_v40  ;;  %v915_v58 = vpack.c.bf16 %v914_v52, %v913_v49 }
 0x160   :  { %2045 = vmatprep.subr.bf16.mxu1 %v2253_v50  ;;  %2063 = vmatprep.subr.bf16.mxu0 %v2254_v51 }
 0x161   :  { %v920_v61 = vsub.f32 %v918_v56, %v908_v42  ;;  %v923_v62 = vmul.f32 %v919_v57, %v2711_v3  ;;  %v2261_v3 = vld [vmem:[%s2883_s3 + $0x178] sm:$0xff]   ;;  %s2311_s3 = smov [#allocation4]  }
 0x162   :  { %s1733_s4 = sshll.u32 %s2311_s3, 4  ;;  %s1734_s4 = int_to_ptr.vmem [resolvable:$true] %s1733_s4 }
 0x163   :  { %2046 = vmatpush3.bf16.msra.mxu1 %v2255_v54  ;;  %2064 = vmatpush3.bf16.msra.mxu0 %v2256_v55  ;;  %v921_v63 = vpack.c.bf16 %v920_v61, %v919_v57  ;;  %v924_v0 = vmul.f32 %v920_v61, %v2713_v5  ;;  %v925_v4 = vsub.f32 %v923_v62, %v913_v49  ;;  %s2285_s21 = scalar_lea.vmem %s1734_s4, 256  ;;  %p2290_p1 = scmp.lt.s32.totalorder %s1734_s4, %s1734_s4 }
 0x164   :  { %2047 = vmatprep.subr.bf16.mxu1 %v2257_v59  ;;  %2065 = vmatprep.subr.bf16.mxu0 %v2258_v60  ;;  %p2286_p0 = scmp.ne.s32.totalorder %s1734_s4, %s2285_s21  ;;  %p2291_p2 = scmp.lt.s32.totalorder %s2285_s21, %s2285_s21 }
 0x165   :  { %1676 = vmatprep.mubr.bf16.mxu0 %v921_v63  ;;  %v926_v5 = vsub.f32 %v924_v0, %v914_v52 }
 0x166   :  { %p2292_p3 = por %p2291_p2, %p2290_p1 }
 0x167   :  { %2048 = vmatpush3.bf16.msra.mxu1 %v2259_v1  ;;  %2066 = vmatpush3.bf16.msra.mxu0 %v2260_v2  ;;  %v927_v9 = vpack.c.bf16 %v926_v5, %v925_v4 }
 0x168   :  { %2049 = vmatprep.subr.bf16.mxu1 %v2261_v3  ;;  %2067 = vmatprep.subr.bf16.mxu0 %v2262_v6  ;;  %p2293_p4 = pnand %p2292_p3, %p2286_p0 }
 0x16b   :  { %2050 = vmatpush3.bf16.msra.mxu1 %v2263_v7  ;;  %2068 = vmatpush3.bf16.msra.mxu0 %v2264_v8 }
 0x16c   :  { %2069 = vmatprep.subr.bf16.mxu0 %v2265_v10  ;;  %2108 = vmatprep.subr.bf16.mxu1 %v2309_v46 }
 0x16e   :  { %1636 = vmatmul.mubr.bf16.vlgmr.msra.gmra.mrb[12].mxu1 %v903_v41 }
 0x16f   :  { %2070 = vmatpush3.bf16.msra.mxu0 %v2266_v11  ;;  %2109 = vmatpush3.bf16.msra.mxu1 %v2267_v12 }
 0x170   :  { %2071 = vmatprep.subr.bf16.mxu0 %v2268_v13  ;;  %2110 = vmatprep.subr.bf16.mxu1 %v2309_v46 }
 0x171   :  { %2124 = vmatprep.mubr.msk.bf16.mxu1 %vm2310_vm0, %v2309_v46 }
 0x173   :  { %2072 = vmatpush3.bf16.msra.mxu0 %v2269_v14  ;;  %2111 = vmatpush3.bf16.msra.mxu1 %v2270_v15 }
 0x174   :  { %2112 = vmatprep.subr.bf16.mxu1 %v2309_v46 }
 0x176   :  { %1677 = vmatmul.mubr.bf16.vlgmr.msra.gmra.mrb[16].mxu0 %v915_v58 }
 0x177   :  { %2113 = vmatpush3.bf16.msra.mxu1 %v2271_v16 }
 0x178   :  { %2114 = vmatprep.subr.bf16.mxu1 %v2309_v46 }
 0x17b   :  { %2115 = vmatpush3.bf16.msra.mxu1 %v2272_v17 }
 0x17c   :  { %2116 = vmatprep.subr.bf16.mxu1 %v2309_v46 }
 0x17f   :  { %2117 = vmatpush3.bf16.msra.mxu1 %v2273_v18 }
 0x180   :  { %2118 = vmatprep.subr.bf16.mxu1 %v2309_v46 }
 0x183   :  { %2119 = vmatpush3.bf16.msra.mxu1 %v2274_v19 }
 0x184   :  { %2120 = vmatprep.subr.bf16.mxu1 %v2309_v46 }
 0x187   :  { %2121 = vmatpush3.bf16.msra.mxu1 %v2275_v20 }
 0x188   :  { %2122 = vmatprep.subr.bf16.mxu1 %v2309_v46 }
 0x18b   :  { %2123 = vmatpush3.bf16.msra.mxu1 %v2276_v21 }
 0x18e   :  { %2125 = vmatmul.mubr.bf16.vlgmr.msra.gmra.mrb[16].mxu1 %v927_v9 }
 0x221   :  { %v2007_v22 = vpop.f32.mrb[8].mxu1 }
 0x222   :  { %v2008_v23 = vpop.f32.mrb[9].mxu1 }
 0x223   :  { %v2009_v24 = vadd.f32 %v2008_v23, %v2007_v22  ;;  %v2010_v25 = vpop.f32.mrb[10].mxu1 }
 0x224   :  { %v2011_v26 = vpop.f32.mrb[11].mxu1 }
 0x225   :  { %v2012_v27 = vadd.f32 %v2011_v26, %v2010_v25  ;;  %v1556_v31 = vadd.f32 %v2009_v24, %v1821_v28 }
 0x227   :  { %v1559_v35 = vadd.f32 %v2012_v27, %v1821_v28 }
 0x229   :  { %v2029_v29 = vpop.f32.mrb[12].mxu0 }
 0x22a   :  { %v2030_v30 = vpop.f32.mrb[13].mxu0 }
 0x22b   :  { %v2031_v32 = vadd.f32 %v2030_v30, %v2029_v29  ;;  %v2032_v33 = vpop.f32.mrb[14].mxu0 }
 0x22c   :  { %v2033_v34 = vpop.f32.mrb[15].mxu0 }
 0x22d   :  { %v1597_v46 = vadd.f32 %v2031_v32, %v1556_v31  ;;  %v2034_v36 = vadd.f32 %v2033_v34, %v2032_v33 }
 0x22f   :  { %v1600_v37 = vadd.f32 %v2034_v36, %v1559_v35 }
 0x241   :  { %v2051_v40 = vpop.f32.mrb[12].mxu1 }
 0x242   :  { %v2052_v41 = vpop.f32.mrb[13].mxu1 }
 0x243   :  { %v2053_v38 = vadd.f32 %v2052_v41, %v2051_v40  ;;  %v2054_v39 = vpop.f32.mrb[14].mxu1 }
 0x244   :  { %v2055_v42 = vpop.f32.mrb[15].mxu1 }
 0x245   :  { %v1638_v43 = vadd.f32 %v2053_v38, %v1597_v46  ;;  %v2056_v44 = vadd.f32 %v2055_v42, %v2054_v39 }
 0x247   :  { %v1641_v45 = vadd.f32 %v2056_v44, %v1600_v37 }
 0x249   :  { %v2073_v47 = vpop.f32.mrb[16].mxu0 }
 0x24a   :  { %v2074_v48 = vpop.f32.mrb[17].mxu0 }
 0x24b   :  { %v2075_v49 = vadd.f32 %v2074_v48, %v2073_v47  ;;  %v2076_v50 = vpop.f32.mrb[18].mxu0 }
 0x24c   :  { %v2077_v51 = vpop.f32.mrb[19].mxu0 }
 0x24d   :  { %v2078_v52 = vadd.f32 %v2077_v51, %v2076_v50  ;;  %v1679_v53 = vadd.f32 %v2075_v49, %v1638_v43 }
 0x24f   :  { %v1682_v54 = vadd.f32 %v2078_v52, %v1641_v45 }
 0x261   :  { %v1719_v55 = vpop.f32.mrb[16].mxu1 }
 0x262   :  { %v1720_v56 = vadd.f32 %v1719_v55, %v1679_v53  ;;  %v2126_v57 = vpop.f32.mrb[17].mxu1 }
 0x263   :  { %v1722_v58 = vpop.f32.mrb[18].mxu1 }
 0x264   :  { %1726 = vst [vmem:[#allocation4] sm:$0xff] %v1720_v56  ;;  %v1723_v59 = vadd.f32 %v1722_v58, %v1682_v54  ;;  %v2127_v60 = vpop.f32.mrb[19].mxu1 }
 0x266   :  { %1727 = vst [vmem:[#allocation4 + $0x8] sm:$0xff] %v1723_v59 }
 0x267   :  { %2296 = shalt.err (!%p2293_p4)
}
 0x268   :  { %s2297_s24 = scalar_lea.hbm %s2885_s5, 256 }
 0x269   :  { %p2298_p5 = scmp.ne.s32.totalorder %s2885_s5, %s2297_s24  ;;  %p2301_p6 = scmp.lt.u32.totalorder %s2297_s24, %s2885_s5 }
 0x26b   :  { %p2303_p7 = pnand %p2301_p6, %p2298_p5 }
 0x26d   :  { %2306 = shalt.err (!%p2303_p7)
}
 0x26e   :  { %s2312_s28 = smov 128   ;;  %s2313_s29 = smov 8  }
 0x26f   :  { %1739 = dma.vmem_to_hbm [thread:$0]  %s1734_s4, 256, %s2885_s5, [#allocation5], %s2312_s28, %s2312_s28, %s2313_s29  }
 0x270   :  { %2307 = dma.done.wait [#allocation5], 256  }
 0x271   :  { %2308 = vsyncadd [#allocation5], 4294967040 }
 0x272   :  { %1743 = vsyncpa [#allocation5], 1 }

</bundles_post_ra>
